<compile_context>
chip_gen: v5e
topology: v5e:2x2
jax: 0.10.0
libtpu: 0.0.40
codegen_flags: <defaults>
</compile_context>

<pallas_src>
import jax
import jax.numpy as jnp
from jax.experimental import pallas as pl
from jax.experimental.pallas import tpu as pltpu


def _ulsam_kernel(x_ref, w1_ref, b1_ref, w2_ref, b2_ref, o_ref):
    # x_ref : (TM, NIN_PAD) tile of tokens
    # w1_ref: (NIN_PAD, S*H) block-diagonal fc1 weights (zero rows in padding)
    # b1_ref: (1, S*H)
    # w2_ref: (S*H, NIN_PAD) block-diagonal fc2 weights (zero cols in padding)
    # b2_ref: (1, NIN_PAD)
    # o_ref : (TM, NIN_PAD)
    xf = x_ref[...].astype(jnp.float32)
    h = jnp.dot(xf, w1_ref[...], preferred_element_type=jnp.float32) + b1_ref[...]
    a = jnp.dot(h, w2_ref[...], preferred_element_type=jnp.float32) + b2_ref[...]
    # sigmoid(a) = 1 / (1 + exp(-a)); exp on the EUP, divide on the EUP
    # approx-recip slot (keeps the VPU free; ~1e-4 relative error).
    attn = pl.reciprocal(1.0 + jnp.exp(-a), approx=True)
    # Gating multiply in f32, single cast at the store.
    o_ref[...] = (xf * attn).astype(o_ref.dtype)


def _block_diag(w):
    """(S, a, b) per-split weights -> (S*a, S*b) block-diagonal matrix."""
    S, a, b = w.shape
    eye = jnp.eye(S, dtype=w.dtype)
    bd = jnp.einsum("sab,st->satb", w, eye)  # block (i,:,j,:) = w[i] * [i==j]
    return bd.reshape(S * a, S * b)


def _vmem_capacity_bytes():
    """Physical per-core VMEM, queried at trace time; conservative fallback."""
    try:
        info = pltpu.get_tpu_info()
        for attr in ("vmem_capacity_bytes", "vmem_size_bytes", "vmem_bytes"):
            cap = getattr(info, attr, None)
            if cap:
                return int(cap)
    except Exception:
        pass
    return 64 << 20  # v7x per-core VMEM; safe lower bound for v5e/v6e too.


def _choose_tm(M, nin_pad, dsize, weight_bytes, vmem_budget):
    """Largest sublane-multiple TM that fits the VMEM budget, with the grid
    forced to >= 2 steps so both v7x TensorCores get work."""
    avail = max(vmem_budget - weight_bytes, 4 * 8 * nin_pad * dsize)
    tm = int(avail // (4 * nin_pad * dsize))  # 2x double-buffered (in + out)
    tm = max(8, (tm // 8) * 8)
    # Cap at ceil(M/2), rounded up to a sublane multiple -> grid length >= 2.
    half = (((M + 1) // 2) + 7) // 8 * 8
    tm = min(tm, half)
    if M <= 8 or tm >= M:
        return M  # single full-extent block (always a legal block shape)
    return tm


def ulsam1d_pallas(x, w1, b1, w2, b2, num_splits):
    """x: (B, L, nin); w1: (S, C, H); b1: (S, 1, H); w2: (S, H, C); b2: (S, 1, C)."""
    B, L, nin = x.shape
    S = num_splits
    assert nin % S == 0, "nin must be divisible by num_splits"
    C = nin // S
    H = w1.shape[2]
    assert w1.shape == (S, C, H) and w2.shape == (S, H, C)
    assert b1.shape == (S, 1, H) and b2.shape == (S, 1, C)
    SH = S * H
    M = B * L

    # Free (contiguous) view -- no HBM round trip.
    x2 = x.reshape(M, nin)

    # One-time weight repack (block-diagonal).  In a training loop hoist/jit
    # this once; here it is tiny relative to the main kernel.
    w1_bd = _block_diag(w1)          # (nin, S*H)
    w2_bd = _block_diag(w2)          # (S*H, nin)
    b1_bd = b1.reshape(1, SH)        # (1, S*H)
    b2_bd = b2.reshape(1, nin)       # (1, nin)

    # Pad the channel (lane) dim to a multiple of 128 -> dense unmasked stores.
    # Padded columns see zero weights/bias, so out_pad[:, nin:] == 0 exactly.
    nin_pad = ((nin + 127) // 128) * 128
    if nin_pad != nin:
        pad = nin_pad - nin
        x2 = jnp.pad(x2, ((0, 0), (0, pad)))
        w1_bd = jnp.pad(w1_bd, ((0, pad), (0, 0)))
        w2_bd = jnp.pad(w2_bd, ((0, 0), (0, pad)))
        b2_bd = jnp.pad(b2_bd, ((0, 0), (0, pad)))

    dsize = jnp.dtype(x.dtype).itemsize
    wsize = jnp.dtype(w1_bd.dtype).itemsize

    # VMEM provisioning: weights are single-buffered (count once); x-in and
    # out tiles are double-buffered by the pipeliner (4 * TM * nin_pad each).
    weight_bytes = (2 * nin_pad * SH + SH + nin_pad) * wsize
    cap = _vmem_capacity_bytes()
    budget = min((cap * 3) // 4, 96 << 20)     # <=48 MiB on v7x, <=96 MiB v5e/v6e
    TM = _choose_tm(M, nin_pad, dsize, weight_bytes, budget)
    grid = (pl.cdiv(M, TM),)

    needed = weight_bytes + 4 * TM * nin_pad * dsize
    vmem_limit = int(min(cap, max(2 * needed, 32 << 20)))

    cost = pl.CostEstimate(
        flops=4 * M * nin_pad * SH,                     # two matmuls per token
        transcendentals=M * nin_pad,                    # exp (+ approx recip)
        bytes_accessed=2 * M * nin_pad * dsize + weight_bytes,
    )

    resident = pl.Buffered(buffer_count=1)  # constant-index inputs: 1 buffer

    out2 = pl.pallas_call(
        _ulsam_kernel,
        out_shape=jax.ShapeDtypeStruct((M, nin_pad), x.dtype),
        grid_spec=pltpu.PrefetchScalarGridSpec(
            num_scalar_prefetch=0,
            grid=grid,
            in_specs=[
                pl.BlockSpec((TM, nin_pad), lambda m: (m, 0)),
                pl.BlockSpec((nin_pad, SH), lambda m: (0, 0), pipeline_mode=resident),
                pl.BlockSpec((1, SH), lambda m: (0, 0), pipeline_mode=resident),
                pl.BlockSpec((SH, nin_pad), lambda m: (0, 0), pipeline_mode=resident),
                pl.BlockSpec((1, nin_pad), lambda m: (0, 0), pipeline_mode=resident),
            ],
            out_specs=pl.BlockSpec((TM, nin_pad), lambda m: (m, 0)),
        ),
        compiler_params=pltpu.CompilerParams(
            dimension_semantics=("parallel",),   # M-tiles shard across v7x's 2 TCs
            vmem_limit_bytes=vmem_limit,
        ),
        cost_estimate=cost,
    )(x2, w1_bd, b1_bd, w2_bd, b2_bd)

    if nin_pad != nin:
        out2 = out2[:, :nin]
    return out2.reshape(B, L, nin)


def ulsam1d_reference(x, w1, b1, w2, b2, num_splits):
    S = num_splits
    chunks = jnp.split(x, S, axis=2)
    outs = []
    for i in range(S):
        xi = chunks[i]
        attn = xi @ w1[i] + b1[i, 0]
        attn = attn @ w2[i] + b2[i, 0]
        attn = jax.nn.sigmoid(attn)
        outs.append(xi * attn)
    return jnp.concatenate(outs, axis=2)


if __name__ == "__main__":
    # Small shapes consistent with the module: nin divisible by num_splits,
    # hidden = chunk_size // 4.
    B, L, nin = 2, 8, 32
    num_splits = 4
    C = nin // num_splits   # 8
    H = C // 4              # 2

    key = jax.random.PRNGKey(0)
    kx, kw1, kb1, kw2, kb2 = jax.random.split(key, 5)

    x = jax.random.normal(kx, (B, L, nin), dtype=jnp.float32)

    # Deterministic parameter init (PyTorch-Linear-style uniform bounds),
    # stored in (in, out) layout so the kernel does x @ W + b.
    bound1 = 1.0 / jnp.sqrt(C)
    bound2 = 1.0 / jnp.sqrt(H)
    w1 = jax.random.uniform(kw1, (num_splits, C, H), jnp.float32, -bound1, bound1)
    b1 = jax.random.uniform(kb1, (num_splits, 1, H), jnp.float32, -bound1, bound1)
    w2 = jax.random.uniform(kw2, (num_splits, H, C), jnp.float32, -bound2, bound2)
    b2 = jax.random.uniform(kb2, (num_splits, 1, C), jnp.float32, -bound2, bound2)

    out = ulsam1d_pallas(x, w1, b1, w2, b2, num_splits)
    out = jax.block_until_ready(out)

    ref = ulsam1d_reference(x, w1, b1, w2, b2, num_splits)
    assert out.shape == (B, L, nin)
    # Tolerance reflects the EUP approx-reciprocal in the sigmoid (~1e-4 rel).
    assert jnp.allclose(out, ref, atol=2e-3, rtol=2e-3), "mismatch vs reference"

    print("KERNEL_OK")
</pallas_src>

<mosaic_0001>
module attributes {stable_mosaic.version = 11 : i64} {
  func.func @_ulsam_kernel(%arg0: i32, %arg1: memref<8x128xf32, #tpu.memory_space<vmem>>, %arg2: memref<128x8xf32, #tpu.memory_space<vmem>>, %arg3: memref<1x8xf32, #tpu.memory_space<vmem>>, %arg4: memref<8x128xf32, #tpu.memory_space<vmem>>, %arg5: memref<1x128xf32, #tpu.memory_space<vmem>>, %arg6: memref<8x128xf32, #tpu.memory_space<vmem>>) attributes {dimension_semantics = [#tpu.dimension_semantics<parallel>], iteration_bounds = array<i64: 2>, scalar_prefetch = 0 : i64, scratch_operands = 0 : i64, tpu.core_type = #tpu.core_type<tc>, window_params = [{transform_indices = @transform_0, window_bounds = array<i64: 8, 128>}, {pipeline_mode = #tpu.pipeline_mode<synchronous>, transform_indices = @transform_1, window_bounds = array<i64: 128, 8>}, {pipeline_mode = #tpu.pipeline_mode<synchronous>, transform_indices = @transform_2, window_bounds = array<i64: 1, 8>}, {pipeline_mode = #tpu.pipeline_mode<synchronous>, transform_indices = @transform_3, window_bounds = array<i64: 8, 128>}, {pipeline_mode = #tpu.pipeline_mode<synchronous>, transform_indices = @transform_4, window_bounds = array<i64: 1, 128>}, {transform_indices = @transform_5, window_bounds = array<i64: 8, 128>}]} {
    %c0 = arith.constant 0 : index
    %c0_0 = arith.constant 0 : index
    %0 = vector.load %arg1[%c0, %c0_0] : memref<8x128xf32, #tpu.memory_space<vmem>>, vector<8x128xf32>
    %c0_1 = arith.constant 0 : index
    %c0_2 = arith.constant 0 : index
    %1 = vector.load %arg2[%c0_1, %c0_2] : memref<128x8xf32, #tpu.memory_space<vmem>>, vector<128x8xf32>
    %cst = arith.constant dense<0.000000e+00> : vector<8x8xf32>
    %2 = tpu.matmul %0, %1, %cst {dimension_numbers = #tpu.dot_dimension_numbers<[1], [0], [0], [1], [0, 0, 1, 1], [], []>} : vector<8x128xf32>, vector<128x8xf32>, vector<8x8xf32> -> vector<8x8xf32>
    %c0_3 = arith.constant 0 : index
    %c0_4 = arith.constant 0 : index
    %3 = vector.load %arg3[%c0_3, %c0_4] : memref<1x8xf32, #tpu.memory_space<vmem>>, vector<1x8xf32>
    %4 = vector.broadcast %3 : vector<1x8xf32> to vector<8x8xf32>
    %5 = arith.addf %2, %4 : vector<8x8xf32>
    %c0_5 = arith.constant 0 : index
    %c0_6 = arith.constant 0 : index
    %6 = vector.load %arg4[%c0_5, %c0_6] : memref<8x128xf32, #tpu.memory_space<vmem>>, vector<8x128xf32>
    %cst_7 = arith.constant dense<0.000000e+00> : vector<8x128xf32>
    %7 = tpu.matmul %5, %6, %cst_7 {dimension_numbers = #tpu.dot_dimension_numbers<[1], [0], [0], [1], [0, 0, 1, 1], [], []>} : vector<8x8xf32>, vector<8x128xf32>, vector<8x128xf32> -> vector<8x128xf32>
    %c0_8 = arith.constant 0 : index
    %c0_9 = arith.constant 0 : index
    %8 = vector.load %arg5[%c0_8, %c0_9] : memref<1x128xf32, #tpu.memory_space<vmem>>, vector<1x128xf32>
    %9 = vector.broadcast %8 : vector<1x128xf32> to vector<8x128xf32>
    %10 = arith.addf %7, %9 : vector<8x128xf32>
    %cst_10 = arith.constant 0.000000e+00 : f32
    %11 = vector.broadcast %cst_10 : f32 to vector<8x128xf32>
    %12 = arith.subf %11, %10 : vector<8x128xf32>
    %13 = math.exp %12 : vector<8x128xf32>
    %cst_11 = arith.constant 1.000000e+00 : f32
    %14 = vector.broadcast %cst_11 : f32 to vector<8x128xf32>
    %15 = arith.addf %14, %13 : vector<8x128xf32>
    %16 = tpu.reciprocal %15 {approx = true} : vector<8x128xf32> -> vector<8x128xf32>
    %17 = arith.mulf %0, %16 : vector<8x128xf32>
    %c0_12 = arith.constant 0 : index
    %c0_13 = arith.constant 0 : index
    %18 = vector.load %arg6[%c0_12, %c0_13] : memref<8x128xf32, #tpu.memory_space<vmem>>, vector<8x128xf32>
    tpu.vector_store %arg6[%c0_12, %c0_13], %17 {strides = array<i32>} : memref<8x128xf32, #tpu.memory_space<vmem>>, vector<8x128xf32>,
    return
  }
  func.func @transform_0(%arg0: i32) -> (i32, i32) {
    %c0_i32 = arith.constant 0 : i32
    %c0_i32_0 = arith.constant 0 : i32
    return %arg0, %c0_i32 : i32, i32
  }
  func.func @transform_1(%arg0: i32) -> (i32, i32) {
    %c0_i32 = arith.constant 0 : i32
    %c0_i32_0 = arith.constant 0 : i32
    %c0_i32_1 = arith.constant 0 : i32
    return %c0_i32, %c0_i32_0 : i32, i32
  }
  func.func @transform_2(%arg0: i32) -> (i32, i32) {
    %c0_i32 = arith.constant 0 : i32
    %c0_i32_0 = arith.constant 0 : i32
    %c0_i32_1 = arith.constant 0 : i32
    return %c0_i32, %c0_i32_0 : i32, i32
  }
  func.func @transform_3(%arg0: i32) -> (i32, i32) {
    %c0_i32 = arith.constant 0 : i32
    %c0_i32_0 = arith.constant 0 : i32
    %c0_i32_1 = arith.constant 0 : i32
    return %c0_i32, %c0_i32_0 : i32, i32
  }
  func.func @transform_4(%arg0: i32) -> (i32, i32) {
    %c0_i32 = arith.constant 0 : i32
    %c0_i32_0 = arith.constant 0 : i32
    %c0_i32_1 = arith.constant 0 : i32
    return %c0_i32, %c0_i32_0 : i32, i32
  }
  func.func @transform_5(%arg0: i32) -> (i32, i32) {
    %c0_i32 = arith.constant 0 : i32
    %c0_i32_0 = arith.constant 0 : i32
    return %arg0, %c0_i32 : i32, i32
  }
}

</mosaic_0001>

<bundles_post_ra>
// kernel: tpu_custom_call.1
= control target key start
LH: loop header
LB: loop body
LE: loop exit
PB: predicated region body
PF: predicated region fallthrough
CT: control target
= control target key end

     0   :  { %10 = vsyncpa [#allocation3], 0  ;;  %s664_s0 = inlined_call_operand.vmem [shape: f32[16,128], index: 0, kind: input, shape index: {}]   ;;  %s665_s1 = inlined_call_operand.vmem [shape: f32[128,8], index: 1, kind: input, shape index: {}]   ;;  %s666_s2 = inlined_call_operand.vmem [shape: f32[1,8], index: 2, kind: input, shape index: {}]   ;;  %s667_s3 = inlined_call_operand.vmem [shape: f32[8,128], index: 3, kind: input, shape index: {}]   ;;  %s668_s4 = inlined_call_operand.vmem [shape: f32[1,128], index: 4, kind: input, shape index: {}]   ;;  %s669_s5 = inlined_call_operand.hbm [shape: f32[16,128], index: 5, kind: output, shape index: {}]  }
   0x1   :  { %12 = vsyncpa [#allocation3 + $0x1], 0  ;;  %s522_s18 = smov 0   ;;  %s524_s19 = smov 0  }
   0x2   :  { %s526_s20 = smov 0   ;;  %s528_s21 = smov 0  }
   0x3 LB: > { %s543_s22 = sadd.s32 4294967295, %s490_s21   ;;  %s372_s23 = sadd.s32 4294967294, %s490_s21   ;;  %s490_s21 = sphi %s528_s21, %s675_s21   ;;  %s486_s20 = sphi %s526_s20, %s674_s20   ;;  %s482_s19 = sphi %s524_s19, %s673_s19   ;;  %s478_s18 = sphi %s522_s18, %s672_s18  }
   0x4   : > { %s547_s24 = sadd.s32 1, %s490_s21   ;;  %s135_s25 = sadd.s32 1, %s486_s20 }
   0x5   : > { %s132_s26 = ssub.s32 %s490_s21, %s547_s24  ;;  %p145_p0 = scmp.ne.s32.totalorder %s486_s20, %s482_s19 }
   0x6   : > { %p133_p1 = scmp.eq.s32.totalorder %s132_s26, 0  ;;  %p146_p2 = scmp.eq.s32.totalorder %s543_s22, 1 }
   0x7   : > { %p151_p3 = scmp.ne.s32.totalorder %s482_s19, %s478_s18  ;;  %p152_p4 = scmp.eq.s32.totalorder %s372_s23, 1 }
   0x8   : > { %s558_s27 = scalar_select %p133_p1, %s486_s20, %s135_s25  }
   0x9   : > { %p560_p5 = por %p146_p2, %p145_p0  ;;  %p564_p6 = por %p152_p4, %p151_p3 }
   0xa   : > { %p375_p7 = scmp.ge.s32.totalorder %s490_s21, 1  ;;  %p189_p8 = scmp.lt.s32.totalorder %s490_s21, 3 }
   0xc   : > { %p190_p9 = pnand %p375_p7, %p189_p8 }
   0xd   : > { %p216_p10 = scmp.lt.s32.totalorder (!%p190_p9), %s543_s22, 1  ;;  %s380_s23 = sshll.u32 (!%p190_p9), %s543_s22, 3 }
   0xe   : > { %193 = sbr.rel (%p190_p9) target bundleno = 332 (0x14c), region = 40  ;;  %s308_s30 = scalar_lea.hbm (!%p190_p9), %s669_s5, %s380_s23 }
   0xf   : > { %s312_s8 = sshll.u32 (!%p190_p9), %s308_s30, 4  ;;  %s448_s13 = scalar_lea.hbm (!%p190_p9), %s669_s5, 16  ;;  %s313_s8 = int_to_ptr.hbm [resolvable:$true] %s312_s8 }
  0x10   : > { %s442_s10 = sshra.s32 (!%p190_p9), %s313_s8, 4  ;;  %s443_s10 = int_to_ptr.hbm [resolvable:$true] %s442_s10 }
  0x11   : > { %p449_p0 = scmp.lt.s32.totalorder (!%p190_p9), %s443_s10, %s669_s5 }
  0x13   : > { %v236_v0 = vld [vmem:[%s665_s1 + $0x78] sm:$0xff]  ;;  %v235_v1 = vld [vmem:[%s665_s1 + $0x70] sm:$0xff]  ;;  %v234_v2 = vld [vmem:[%s665_s1 + $0x68] sm:$0xff]  ;;  %s217_s11 = scalar_select %p216_p10, %s543_s22, 1  ;;  %vm266_vm0 = vcmask 64512  }
  0x14   : > { %241 = vmatpush.msra.mxu0 %v236_v0  ;;  %v233_v3 = vld [vmem:[%s665_s1 + $0x60] sm:$0xff]  ;;  %v232_v4 = vld [vmem:[%s665_s1 + $0x58] sm:$0xff]  ;;  %v231_v5 = vld [vmem:[%s665_s1 + $0x50] sm:$0xff] }
  0x15   : > { %v230_v6 = vld [vmem:[%s665_s1 + $0x48] sm:$0xff]  ;;  %v229_v7 = vld [vmem:[%s665_s1 + $0x40] sm:$0xff]  ;;  %v228_v8 = vld [vmem:[%s665_s1 + $0x38] sm:$0xff]  ;;  %s377_s16 = sshll.u32 %s217_s11, 3  ;;  %s444_s11 = scalar_lea.hbm %s443_s10, 8 }
  0x16   : > { %242 = vmatpush.msra.mxu0 %v235_v1  ;;  %v227_v9 = vld [vmem:[%s665_s1 + $0x30] sm:$0xff]  ;;  %v226_v10 = vld [vmem:[%s665_s1 + $0x28] sm:$0xff]  ;;  %v225_v11 = vld [vmem:[%s665_s1 + $0x20] sm:$0xff]  ;;  %s219_s7 = scalar_lea.vmem %s664_s0, %s377_s16  ;;  %s213_s16 = sand.u32 1, %s482_s19  }
  0x17   : > { %v224_v12 = vld [vmem:[%s665_s1 + $0x18] sm:$0xff]  ;;  %v223_v13 = vld [vmem:[%s665_s1 + $0x10] sm:$0xff]  ;;  %v222_v14 = vld [vmem:[%s665_s1 + $0x8] sm:$0xff]  ;;  %s376_s17 = sshll.u32 %s213_s16, 3  ;;  %s298_s9 = scalar_lea.sflag [#allocation3], %s213_s16 }
  0x18   : > { %243 = vmatpush.msra.mxu0 %v234_v2  ;;  %v221_v15 = vld [vmem:[%s665_s1] sm:$0xff]  ;;  %s215_s6 = scalar_lea.vmem [#allocation2], %s376_s17  ;;  %p445_p11 = scmp.ne.s32.totalorder %s443_s10, %s444_s11 }
  0x19   : > { %v220_v16 = vld [vmem:[%s219_s7] sm:$0xff]  ;;  %s310_s7 = sshll.u32 %s215_s6, 4  ;;  %p450_p1 = scmp.lt.s32.totalorder %s448_s13, %s444_s11  ;;  %s311_s7 = int_to_ptr.vmem [resolvable:$true] %s310_s7 }
  0x1a   : > { %244 = vmatpush.msra.mxu0 %v233_v3  ;;  %v261_v17 = vld [vmem:[%s667_s3] sm:$0xff]  ;;  %p446_p12 = pnand %p445_p11, %p560_p5 }
  0x1b   : > { %285 = vmatpush.msra.mxu1 %v261_v17  ;;  %v422_v18 = vld [vmem:[%s666_s2] ss:$0 sm:$0xff]  ;;  %p451_p2 = por %p450_p1, %p449_p0 }
  0x1c   : > { %245 = vmatpush.msra.mxu0 %v232_v4  ;;  %v423_v21 = vld [vmem:[%s668_s4] ss:$0 sm:$0xff]  ;;  %p447_p13 = pneg %p446_p12 }
  0x1e   : > { %246 = vmatpush.msra.mxu0 %v231_v5  ;;  %p452_p3 = pnand %p451_p2, %p447_p13 }
  0x20   : > { %247 = vmatpush.msra.mxu0 %v230_v6 }
  0x22   : > { %248 = vmatpush.msra.mxu0 %v229_v7 }
  0x24   : > { %249 = vmatpush.msra.mxu0 %v228_v8 }
  0x26   : > { %250 = vmatpush.msra.mxu0 %v227_v9 }
  0x28   : > { %251 = vmatpush.msra.mxu0 %v226_v10 }
  0x2a   : > { %252 = vmatpush.msra.mxu0 %v225_v11 }
  0x2c   : > { %253 = vmatpush.msra.mxu0 %v224_v12 }
  0x2e   : > { %254 = vmatpush.msra.mxu0 %v223_v13 }
  0x30   : > { %255 = vmatpush.msra.mxu0 %v222_v14 }
  0x32   : > { %256 = vmatpush.msra.mxu0 %v221_v15 }
  0x33   : > { %257 = vmatmul.f32.vlgmr.msra.gmra.mxu0 %v220_v16 }
  0xb0   : > { %v258_v19 = vpop.f32.mrf.mxu0 }
  0xb1   : > { %v259_v20 = vadd.f32 %v422_v18, %v258_v19 }
  0xb3   : > { %378 = vmatmul.msk.f32.vlgmr.msra.gmra.mxu1 %vm266_vm0, %v259_v20 }
 0x130   : > { %v287_v22 = vpop.f32.mrf.mxu1 }
 0x131   : > { %v288_v23 = vadd.f32 %v423_v21, %v287_v22 }
 0x133   : > { %v290_v24 = vsub.f32 0.0, %v288_v23 }
 0x135   : > { %v291_v25 = vmul.f32 1.442695, %v290_v24 }
 0x137   : > { %424 = vpow2.f32 %v291_v25 }
 0x13d   : > { %v425_v26 = vpop.eup %424 }
 0x13e   : > { %v293_v27 = vadd.f32 1.0, %v425_v26 }
 0x140   : > { %426 = vrcp.f32 %v293_v27 }
 0x146   : > { %v427_v28 = vpop.eup %426 }
 0x147   : > { %v295_v29 = vmul.f32 %v427_v28, %v220_v16 }
 0x149   : > { %296 = vst [vmem:[%s215_s6] sm:$0xff] %v295_v29 }
 0x14a   : > { %455 = shalt.err (!%p452_p3)
}
 0x14b   : > { %383 = dma.vmem_to_hbm [thread:$0]  (%p560_p5), %s311_s7, 128, %s313_s8, %s298_s9  }
 0x14c PF: > { %p389_p4 = scmp.ge.s32.totalorder %s490_s21, 2  ;;  %s324_s16 = sand.u32 1, %s478_s18  }
 0x14d   : > { %s325_s17 = scalar_lea.sflag [#allocation3], %s324_s16 }
 0x14e   : > { %p386_p7 = pnand %p389_p4, %p564_p6 }
 0x150   : > { %p387_p8 = pneg %p386_p7 }
 0x152   : > { %473 = dma.done.wait (%p387_p8), %s325_s17, 128  }
 0x153   : > { %475 = vsyncadd (%p387_p8), %s325_s17, 4294967168  ;;  %p15_p9 = scmp.ge.s32.totalorder %s547_s24, 4   ;;  %s672_s18 = smov %s482_s19 }
 0x154   : > { %s673_s19 = smov %s486_s20  ;;  %s674_s20 = smov %s558_s27 }
 0x155   : > { %s675_s21 = smov %s547_s24  ;;  %17 = sbr.rel (!%p15_p9) target bundleno = 3 (0x3), region = 75 }
 0x15a   :  { %331 = vsyncpa [#allocation3], 1 }
 0x15b   :  { %333 = vsyncpa [#allocation3 + $0x1], 1 }

</bundles_post_ra>
